<compile_context>
chip_gen: v7x
topology: tpu7x:2x2x1
jax: 0.10.0
libtpu: 0.0.40
codegen_flags: <defaults>
</compile_context>

<pallas_src>
import jax
import jax.numpy as jnp
from jax.experimental import pallas as pl
from jax.experimental.pallas import tpu as pltpu

_LANE = 128
_SUBLANE = 8


def _round_up(x, m):
    return (x + m - 1) // m * m


def diffusion_kernel(t_sched_ref, x0_ref, noise_ref, w1x_ref, w1t_ref, b1_ref,
                     w2_ref, b2_ref, xt_ref):
    s = pl.program_id(1)                  # time-step index (sequential axis)
    t = t_sched_ref[s]                    # scalar f32 read from SMEM
    one_minus_t = 1.0 - t

    # Load the initial state into the VMEM-resident output block once per
    # batch tile; afterwards xt_ref carries the state across the T axis.
    @pl.when(s == 0)
    def _():
        xt_ref[...] = x0_ref[...]

    xt_prime = xt_ref[...] + noise_ref[...] * jnp.sqrt(one_minus_t)

    # Linear(dims+1, dims) with cat([xt_prime, t]) folded algebraically:
    #   h @ W1^T = xt_prime @ W1^T[:D, :] + t * W1^T[D, :]
    h1 = (jnp.dot(xt_prime, w1x_ref[...], preferred_element_type=jnp.float32)
          + t * w1t_ref[...] + b1_ref[...])
    h1 = jnp.maximum(h1, 0.0)

    h2 = jnp.dot(h1, w2_ref[...], preferred_element_type=jnp.float32) + b2_ref[...]
    ft = jnp.tanh(h2)

    # Residual update; stays resident in VMEM for the next time step.
    xt_ref[...] = xt_prime + one_minus_t * ft


def _pad_params(params, dp):
    """Zero-pad kernel-layout params from (D, ...) to lane-dense (dp, ...)."""
    w1x, w1t, b1, w2, b2 = params
    d = w1x.shape[0]
    z2 = jnp.zeros((dp, dp), jnp.float32)
    z1 = jnp.zeros((1, dp), jnp.float32)
    return (z2.at[:d, :d].set(w1x),
            z1.at[:, :d].set(w1t.reshape(1, d)),
            z1.at[:, :d].set(b1.reshape(1, d)),
            z2.at[:d, :d].set(w2),
            z1.at[:, :d].set(b2.reshape(1, d)))


def diffusion_sample(xt0, t_sched, noises, params, *, b_tile=128):
    """Run T fused diffusion steps on a batch in a single pallas_call.

    xt0:     (B, D) f32  initial state
    t_sched: (T,)   f32  per-step t values
    noises:  (T, B, D) f32 per-step noise
    returns  (B, D) f32  state after T steps
    """
    xt0 = jnp.asarray(xt0, jnp.float32)
    t_sched = jnp.asarray(t_sched, jnp.float32).reshape(-1)
    noises = jnp.asarray(noises, jnp.float32)
    B, D = xt0.shape
    T = t_sched.shape[0]

    dp = _round_up(max(D, _LANE), _LANE)        # lane-dense feature dim (>=128)
    bp = _round_up(B, _SUBLANE)                 # sublane-aligned batch
    bt = min(b_tile, bp)                        # batch tile
    bp = _round_up(bp, bt)
    n_btiles = bp // bt

    x0_p = jnp.zeros((bp, dp), jnp.float32).at[:B, :D].set(xt0)
    noise_p = jnp.zeros((T, bp, dp), jnp.float32).at[:, :B, :D].set(noises)
    w1x, w1t, b1, w2, b2 = _pad_params(params, dp)

    const2 = lambda b, s: (0, 0)                # weights stay VMEM-resident
    out = pl.pallas_call(
        diffusion_kernel,
        out_shape=jax.ShapeDtypeStruct((bp, dp), jnp.float32),
        grid=(n_btiles, T),
        in_specs=[
            pl.BlockSpec(memory_space=pltpu.MemorySpace.SMEM),         # t schedule
            pl.BlockSpec((bt, dp), lambda b, s: (b, 0)),               # x0 tile
            pl.BlockSpec((None, bt, dp), lambda b, s: (s, b, 0)),      # noise[s]
            pl.BlockSpec((dp, dp), const2),                            # w1x
            pl.BlockSpec((1, dp), const2),                             # w1t
            pl.BlockSpec((1, dp), const2),                             # b1
            pl.BlockSpec((dp, dp), const2),                            # w2
            pl.BlockSpec((1, dp), const2),                             # b2
        ],
        out_specs=pl.BlockSpec((bt, dp), lambda b, s: (b, 0)),         # carried state
        compiler_params=pltpu.CompilerParams(
            dimension_semantics=("parallel", "arbitrary")),
    )(t_sched, x0_p, noise_p, w1x, w1t, b1, w2, b2)
    return out[:B, :D]


def diffusion_function(xt, t, noise, params):
    """Single forward step, matching the PyTorch module: (D,), (), (D,) -> (D,)."""
    D = xt.shape[0]
    out = diffusion_sample(xt.reshape(1, D),
                           jnp.reshape(t, (1,)),
                           noise.reshape(1, 1, D),
                           params)
    return out.reshape(D)


def init_params(key, dims):
    """Uniform(+-1/sqrt(fan_in)) init mimicking torch.nn.Linear defaults.

    Kernel-friendly transposed layout:
      w1x (D, D) multiplies xt_prime, w1t (1, D) multiplies the scalar t
      (together they are W1^T), b1 (D,), w2 (D, D) = W2^T, b2 (D,).
    """
    k1, k2, k3, k4 = jax.random.split(key, 4)
    bound1 = 1.0 / jnp.sqrt(dims + 1.0)
    bound2 = 1.0 / jnp.sqrt(float(dims))
    W1 = jax.random.uniform(k1, (dims, dims + 1), jnp.float32, -bound1, bound1)
    b1 = jax.random.uniform(k2, (dims,), jnp.float32, -bound1, bound1)
    W2 = jax.random.uniform(k3, (dims, dims), jnp.float32, -bound2, bound2)
    b2 = jax.random.uniform(k4, (dims,), jnp.float32, -bound2, bound2)
    W1T = W1.T
    return (W1T[:dims, :], W1T[dims:dims + 1, :], b1, W2.T, b2)


def diffusion_step_ref(xt, t, noise, params):
    """Pure-JAX mirror of DiffusionFunction.forward for a single (D,) sample."""
    w1x, w1t, b1, w2, b2 = params
    xt_prime = xt + noise * jnp.sqrt(1.0 - t)
    h = jnp.concatenate([xt_prime, jnp.reshape(t, (1,))], axis=0)    # (D+1,)
    W1T = jnp.concatenate([w1x, w1t], axis=0)                        # (D+1, D)
    h1 = jnp.maximum(h @ W1T + b1, 0.0)
    ft = jnp.tanh(h1 @ w2 + b2)
    return xt_prime + (1.0 - t) * ft


def diffusion_sample_ref(xt0, t_sched, noises, params):
    xt = xt0
    for s in range(t_sched.shape[0]):
        xt = jax.vmap(
            lambda x, n: diffusion_step_ref(x, t_sched[s], n, params))(xt, noises[s])
    return xt


if __name__ == "__main__":
    dims = 32
    B = 8
    T = 4
    key = jax.random.PRNGKey(0)
    kp, kx, kn, kn2 = jax.random.split(key, 4)

    params = init_params(kp, dims)

    # --- single-step check: exact semantics of DiffusionFunction.forward ---
    xt = jax.random.normal(kx, (dims,), jnp.float32)
    noise = jax.random.normal(kn, (dims,), jnp.float32)
    t = jnp.float32(0.3)
    out1 = jax.block_until_ready(diffusion_function(xt, t, noise, params))
    ref1 = diffusion_step_ref(xt, t, noise, params)
    assert out1.shape == (dims,)
    assert jnp.allclose(out1, ref1, atol=3e-5, rtol=3e-5), (out1, ref1)

    # --- fused multi-step, batched sampler (one pallas_call for all T steps) ---
    xt0 = jax.random.normal(kx, (B, dims), jnp.float32)
    noises = jax.random.normal(kn2, (T, B, dims), jnp.float32)
    t_sched = jnp.linspace(0.9, 0.1, T).astype(jnp.float32)
    outT = jax.block_until_ready(diffusion_sample(xt0, t_sched, noises, params))
    refT = diffusion_sample_ref(xt0, t_sched, noises, params)
    assert outT.shape == (B, dims)
    assert jnp.allclose(outT, refT, atol=1e-4, rtol=1e-4), (outT, refT)

    print("KERNEL_OK")
</pallas_src>

<mosaic_0001>
module attributes {stable_mosaic.version = 11 : i64} {
  func.func @diffusion_kernel(%arg0: i32, %arg1: i32, %arg2: memref<1xf32, #tpu.memory_space<smem>>, %arg3: memref<8x128xf32, #tpu.memory_space<vmem>>, %arg4: memref<1x8x128xf32, #tpu.memory_space<vmem>>, %arg5: memref<128x128xf32, #tpu.memory_space<vmem>>, %arg6: memref<1x128xf32, #tpu.memory_space<vmem>>, %arg7: memref<1x128xf32, #tpu.memory_space<vmem>>, %arg8: memref<128x128xf32, #tpu.memory_space<vmem>>, %arg9: memref<1x128xf32, #tpu.memory_space<vmem>>, %arg10: memref<8x128xf32, #tpu.memory_space<vmem>>) attributes {dimension_semantics = [#tpu.dimension_semantics<parallel>, #tpu.dimension_semantics<arbitrary>], iteration_bounds = array<i64: 1, 1>, scalar_prefetch = 0 : i64, scratch_operands = 0 : i64, tpu.core_type = #tpu.core_type<tc>, window_params = [{transform_indices = @transform_0, window_bounds = array<i64: 1>}, {transform_indices = @transform_1, window_bounds = array<i64: 8, 128>}, {transform_indices = @transform_2, window_bounds = array<i64: 1, 8, 128>}, {pipeline_mode = #tpu.pipeline_mode<synchronous>, transform_indices = @transform_3, window_bounds = array<i64: 128, 128>}, {pipeline_mode = #tpu.pipeline_mode<synchronous>, transform_indices = @transform_4, window_bounds = array<i64: 1, 128>}, {pipeline_mode = #tpu.pipeline_mode<synchronous>, transform_indices = @transform_5, window_bounds = array<i64: 1, 128>}, {pipeline_mode = #tpu.pipeline_mode<synchronous>, transform_indices = @transform_6, window_bounds = array<i64: 128, 128>}, {pipeline_mode = #tpu.pipeline_mode<synchronous>, transform_indices = @transform_7, window_bounds = array<i64: 1, 128>}, {transform_indices = @transform_8, window_bounds = array<i64: 8, 128>}]} {
    %0 = arith.index_cast %arg1 : i32 to index
    %1 = memref.load %arg2[%0] : memref<1xf32, #tpu.memory_space<smem>>
    %cst = arith.constant 1.000000e+00 : f32
    %2 = arith.subf %cst, %1 : f32
    %c0_i32 = arith.constant 0 : i32
    %3 = arith.cmpi eq, %arg1, %c0_i32 : i32
    %4 = arith.extui %3 : i1 to i32
    %c0_i32_0 = arith.constant 0 : i32
    %5 = arith.cmpi ne, %4, %c0_i32_0 : i32
    scf.if %5 {
      %c0_20 = arith.constant 0 : index
      %c0_21 = arith.constant 0 : index
      %35 = vector.load %arg3[%c0_20, %c0_21] : memref<8x128xf32, #tpu.memory_space<vmem>>, vector<8x128xf32>
      %c0_22 = arith.constant 0 : index
      %c0_23 = arith.constant 0 : index
      %36 = vector.load %arg10[%c0_22, %c0_23] : memref<8x128xf32, #tpu.memory_space<vmem>>, vector<8x128xf32>
      tpu.vector_store %arg10[%c0_22, %c0_23], %35 {strides = array<i32>} : memref<8x128xf32, #tpu.memory_space<vmem>>, vector<8x128xf32>,
    } else {
    }
    %c0 = arith.constant 0 : index
    %c0_1 = arith.constant 0 : index
    %6 = vector.load %arg10[%c0, %c0_1] : memref<8x128xf32, #tpu.memory_space<vmem>>, vector<8x128xf32>
    %c0_2 = arith.constant 0 : index
    %c0_3 = arith.constant 0 : index
    %c0_4 = arith.constant 0 : index
    %7 = vector.load %arg4[%c0_2, %c0_3, %c0_4] : memref<1x8x128xf32, #tpu.memory_space<vmem>>, vector<1x8x128xf32>
    %8 = vector.shape_cast %7 : vector<1x8x128xf32> to vector<8x128xf32>
    %9 = math.sqrt %2 : f32
    %10 = vector.broadcast %9 : f32 to vector<8x128xf32>
    %11 = arith.mulf %8, %10 : vector<8x128xf32>
    %12 = arith.addf %6, %11 : vector<8x128xf32>
    %c0_5 = arith.constant 0 : index
    %c0_6 = arith.constant 0 : index
    %13 = vector.load %arg5[%c0_5, %c0_6] : memref<128x128xf32, #tpu.memory_space<vmem>>, vector<128x128xf32>
    %cst_7 = arith.constant dense<0.000000e+00> : vector<8x128xf32>
    %14 = tpu.matmul %12, %13, %cst_7 {dimension_numbers = #tpu.dot_dimension_numbers<[1], [0], [0], [1], [0, 0, 1, 1], [], []>} : vector<8x128xf32>, vector<128x128xf32>, vector<8x128xf32> -> vector<8x128xf32>
    %c0_8 = arith.constant 0 : index
    %c0_9 = arith.constant 0 : index
    %15 = vector.load %arg6[%c0_8, %c0_9] : memref<1x128xf32, #tpu.memory_space<vmem>>, vector<1x128xf32>
    %16 = vector.broadcast %1 : f32 to vector<1x128xf32>
    %17 = arith.mulf %16, %15 : vector<1x128xf32>
    %18 = vector.broadcast %17 : vector<1x128xf32> to vector<8x128xf32>
    %19 = arith.addf %14, %18 : vector<8x128xf32>
    %c0_10 = arith.constant 0 : index
    %c0_11 = arith.constant 0 : index
    %20 = vector.load %arg7[%c0_10, %c0_11] : memref<1x128xf32, #tpu.memory_space<vmem>>, vector<1x128xf32>
    %21 = vector.broadcast %20 : vector<1x128xf32> to vector<8x128xf32>
    %22 = arith.addf %19, %21 : vector<8x128xf32>
    %cst_12 = arith.constant 0.000000e+00 : f32
    %23 = vector.broadcast %cst_12 : f32 to vector<8x128xf32>
    %24 = arith.maximumf %22, %23 : vector<8x128xf32>
    %c0_13 = arith.constant 0 : index
    %c0_14 = arith.constant 0 : index
    %25 = vector.load %arg8[%c0_13, %c0_14] : memref<128x128xf32, #tpu.memory_space<vmem>>, vector<128x128xf32>
    %cst_15 = arith.constant dense<0.000000e+00> : vector<8x128xf32>
    %26 = tpu.matmul %24, %25, %cst_15 {dimension_numbers = #tpu.dot_dimension_numbers<[1], [0], [0], [1], [0, 0, 1, 1], [], []>} : vector<8x128xf32>, vector<128x128xf32>, vector<8x128xf32> -> vector<8x128xf32>
    %c0_16 = arith.constant 0 : index
    %c0_17 = arith.constant 0 : index
    %27 = vector.load %arg9[%c0_16, %c0_17] : memref<1x128xf32, #tpu.memory_space<vmem>>, vector<1x128xf32>
    %28 = vector.broadcast %27 : vector<1x128xf32> to vector<8x128xf32>
    %29 = arith.addf %26, %28 : vector<8x128xf32>
    %30 = math.tanh %29 : vector<8x128xf32>
    %31 = vector.broadcast %2 : f32 to vector<8x128xf32>
    %32 = arith.mulf %31, %30 : vector<8x128xf32>
    %33 = arith.addf %12, %32 : vector<8x128xf32>
    %c0_18 = arith.constant 0 : index
    %c0_19 = arith.constant 0 : index
    %34 = vector.load %arg10[%c0_18, %c0_19] : memref<8x128xf32, #tpu.memory_space<vmem>>, vector<8x128xf32>
    tpu.vector_store %arg10[%c0_18, %c0_19], %33 {strides = array<i32>} : memref<8x128xf32, #tpu.memory_space<vmem>>, vector<8x128xf32>,
    return
  }
  func.func @transform_0(%arg0: i32, %arg1: i32) -> i32 {
    %c0_i32 = arith.constant 0 : i32
    %c0_i32_0 = arith.constant 0 : i32
    return %c0_i32 : i32
  }
  func.func @transform_1(%arg0: i32, %arg1: i32) -> (i32, i32) {
    %c0_i32 = arith.constant 0 : i32
    %c0_i32_0 = arith.constant 0 : i32
    return %arg0, %c0_i32 : i32, i32
  }
  func.func @transform_2(%arg0: i32, %arg1: i32) -> (i32, i32, i32) {
    %c0_i32 = arith.constant 0 : i32
    %c0_i32_0 = arith.constant 0 : i32
    return %arg1, %arg0, %c0_i32 : i32, i32, i32
  }
  func.func @transform_3(%arg0: i32, %arg1: i32) -> (i32, i32) {
    %c0_i32 = arith.constant 0 : i32
    %c0_i32_0 = arith.constant 0 : i32
    %c0_i32_1 = arith.constant 0 : i32
    return %c0_i32, %c0_i32_0 : i32, i32
  }
  func.func @transform_4(%arg0: i32, %arg1: i32) -> (i32, i32) {
    %c0_i32 = arith.constant 0 : i32
    %c0_i32_0 = arith.constant 0 : i32
    %c0_i32_1 = arith.constant 0 : i32
    return %c0_i32, %c0_i32_0 : i32, i32
  }
  func.func @transform_5(%arg0: i32, %arg1: i32) -> (i32, i32) {
    %c0_i32 = arith.constant 0 : i32
    %c0_i32_0 = arith.constant 0 : i32
    %c0_i32_1 = arith.constant 0 : i32
    return %c0_i32, %c0_i32_0 : i32, i32
  }
  func.func @transform_6(%arg0: i32, %arg1: i32) -> (i32, i32) {
    %c0_i32 = arith.constant 0 : i32
    %c0_i32_0 = arith.constant 0 : i32
    %c0_i32_1 = arith.constant 0 : i32
    return %c0_i32, %c0_i32_0 : i32, i32
  }
  func.func @transform_7(%arg0: i32, %arg1: i32) -> (i32, i32) {
    %c0_i32 = arith.constant 0 : i32
    %c0_i32_0 = arith.constant 0 : i32
    %c0_i32_1 = arith.constant 0 : i32
    return %c0_i32, %c0_i32_0 : i32, i32
  }
  func.func @transform_8(%arg0: i32, %arg1: i32) -> (i32, i32) {
    %c0_i32 = arith.constant 0 : i32
    %c0_i32_0 = arith.constant 0 : i32
    return %arg0, %c0_i32 : i32, i32
  }
}

</mosaic_0001>

<bundles_post_ra>
// kernel: tpu_custom_call.1
= control target key start
LH: loop header
LB: loop body
LE: loop exit
PB: predicated region body
PF: predicated region fallthrough
CT: control target
= control target key end

     0   :  { %14 = vsyncpa [#allocation4], 0  ;;  %s766_s0 = inlined_call_operand.<no memory space> [shape: f32[1], index: 0, kind: input, shape index: {}]   ;;  %s767_s1 = inlined_call_operand.hbm [shape: f32[8,128], index: 1, kind: input, shape index: {}]   ;;  %s768_s2 = inlined_call_operand.hbm [shape: f32[1,8,128], index: 2, kind: input, shape index: {}]   ;;  %s769_s3 = inlined_call_operand.hbm [shape: f32[128,128], index: 3, kind: input, shape index: {}]   ;;  %s770_s4 = inlined_call_operand.vmem [shape: f32[1,128], index: 4, kind: input, shape index: {}]   ;;  %s771_s5 = inlined_call_operand.vmem [shape: f32[1,128], index: 5, kind: input, shape index: {}]   ;;  %s772_s6 = inlined_call_operand.hbm [shape: f32[128,128], index: 6, kind: input, shape index: {}]   ;;  %s773_s7 = inlined_call_operand.vmem [shape: f32[1,128], index: 7, kind: input, shape index: {}]   ;;  %s774_s8 = inlined_call_operand.hbm [shape: f32[8,128], index: 8, kind: output, shape index: {}]  }
   0x1   :  { %15 = vsyncpa [#allocation7], 0 }
   0x2   :  { %16 = vsyncpa [#allocation10], 0 }
   0x3   :  { %17 = vsyncpa [#allocation5], 0  ;;  %s611_s27 = smov [#allocation6]   ;;  %s612_s29 = smov [#allocation3]  }
   0x4   :  { %s36_s28 = sshll.u32 %s611_s27, 4  ;;  %s26_s30 = sshll.u32 %s612_s29, 4  ;;  %s37_s28 = int_to_ptr.vmem [resolvable:$true] %s36_s28  ;;  %s27_s30 = int_to_ptr.vmem [resolvable:$true] %s26_s30 }
   0x5   :  { %s493_s11 = scalar_lea.hbm %s768_s2, 128 }
   0x6   :  { %p494_p0 = scmp.ne.s32.totalorder %s768_s2, %s493_s11  ;;  %p497_p1 = scmp.lt.u32.totalorder %s493_s11, %s768_s2 }
   0x8   :  { %p499_p2 = pnand %p497_p1, %p494_p0 }
   0xa   :  { %502 = shalt.err (!%p499_p2)
}
   0xb   :  { %s503_s16 = scalar_lea.vmem %s37_s28, 128  ;;  %p508_p4 = scmp.lt.s32.totalorder %s37_s28, %s37_s28 }
   0xc   :  { %p504_p3 = scmp.ne.s32.totalorder %s37_s28, %s503_s16  ;;  %p509_p5 = scmp.lt.s32.totalorder %s503_s16, %s503_s16 }
   0xe   :  { %p510_p6 = por %p509_p5, %p508_p4 }
  0x10   :  { %p511_p7 = pnand %p510_p6, %p504_p3 }
  0x12   :  { %514 = shalt.err (!%p511_p7)
}
  0x13   :  { %39 = dma.hbm_to_vmem [thread:$0]  %s768_s2, 128, %s37_s28, [#allocation7]  }
  0x14   :  { %s515_s21 = scalar_lea.hbm %s767_s1, 128 }
  0x15   :  { %p516_p8 = scmp.ne.s32.totalorder %s767_s1, %s515_s21  ;;  %p519_p9 = scmp.lt.u32.totalorder %s515_s21, %s767_s1 }
  0x17   :  { %p521_p10 = pnand %p519_p9, %p516_p8 }
  0x19   :  { %524 = shalt.err (!%p521_p10)
}
  0x1a   :  { %s525_s26 = scalar_lea.vmem %s27_s30, 128  ;;  %p530_p12 = scmp.lt.s32.totalorder %s27_s30, %s27_s30 }
  0x1b   :  { %p526_p11 = scmp.ne.s32.totalorder %s27_s30, %s525_s26  ;;  %p531_p13 = scmp.lt.s32.totalorder %s525_s26, %s525_s26 }
  0x1d   :  { %p532_p0 = por %p531_p13, %p530_p12 }
  0x1f   :  { %p533_p1 = pnand %p532_p0, %p526_p11 }
  0x21   :  { %536 = shalt.err (!%p533_p1)
}
  0x22   :  { %29 = dma.hbm_to_vmem [thread:$0]  %s767_s1, 128, %s27_s30, [#allocation4]  }
  0x23   :  { %s613_s28 = smov [#allocation8]   ;;  %s537_s11 = scalar_lea.hbm %s769_s3, 2048 }
  0x24   :  { %s45_s29 = sshll.u32 %s613_s28, 4  ;;  %p538_p2 = scmp.ne.s32.totalorder %s769_s3, %s537_s11  ;;  %s46_s29 = int_to_ptr.vmem [resolvable:$true] %s45_s29 }
  0x25   :  { %p541_p3 = scmp.lt.u32.totalorder %s537_s11, %s769_s3 }
  0x27   :  { %p543_p4 = pnand %p541_p3, %p538_p2 }
  0x29   :  { %546 = shalt.err (!%p543_p4)
}
  0x2a   :  { %s547_s16 = scalar_lea.vmem %s46_s29, 2048  ;;  %p552_p6 = scmp.lt.s32.totalorder %s46_s29, %s46_s29 }
  0x2b   :  { %p548_p5 = scmp.ne.s32.totalorder %s46_s29, %s547_s16  ;;  %p553_p7 = scmp.lt.s32.totalorder %s547_s16, %s547_s16 }
  0x2d   :  { %p554_p8 = por %p553_p7, %p552_p6 }
  0x2f   :  { %p555_p9 = pnand %p554_p8, %p548_p5 }
  0x31   :  { %558 = shalt.err (!%p555_p9)
}
  0x32   :  { %s614_s1 = smov 128   ;;  %s615_s30 = smov 8  }
  0x33   :  { %51 = dma.hbm_to_vmem [thread:$0]  %s769_s3, 2048, %s46_s29, [#allocation7], %s614_s1, %s614_s1, %s615_s30  }
  0x34   :  { %s616_s19 = smov [#allocation9]   ;;  %s559_s23 = scalar_lea.hbm %s772_s6, 2048 }
  0x35   :  { %s61_s20 = sshll.u32 %s616_s19, 4  ;;  %p560_p10 = scmp.ne.s32.totalorder %s772_s6, %s559_s23  ;;  %s62_s20 = int_to_ptr.vmem [resolvable:$true] %s61_s20 }
  0x36   :  { %p563_p11 = scmp.lt.u32.totalorder %s559_s23, %s772_s6 }
  0x38   :  { %p565_p12 = pnand %p563_p11, %p560_p10 }
  0x3a   :  { %568 = shalt.err (!%p565_p12)
}
  0x3b   :  { %s569_s27 = scalar_lea.vmem %s62_s20, 2048  ;;  %p574_p0 = scmp.lt.s32.totalorder %s62_s20, %s62_s20 }
  0x3c   :  { %p570_p13 = scmp.ne.s32.totalorder %s62_s20, %s569_s27  ;;  %p575_p1 = scmp.lt.s32.totalorder %s569_s27, %s569_s27 }
  0x3e   :  { %p576_p2 = por %p575_p1, %p574_p0 }
  0x40   :  { %p577_p3 = pnand %p576_p2, %p570_p13 }
  0x42   :  { %580 = shalt.err (!%p577_p3)
}
  0x43   :  { %67 = dma.hbm_to_vmem [thread:$0]  %s772_s6, 2048, %s62_s20, [#allocation10], %s614_s1, %s614_s1, %s615_s30  }
  0x44   :  { %603 = dma.done.wait [#allocation4], 128  }
  0x45   :  { %604 = vsyncadd [#allocation4], 4294967168 }
  0x46   :  { %605 = dma.done.wait [#allocation7], 2176  }
  0x47   :  { %606 = vsyncadd [#allocation7], 4294965120  ;;  %s83_s10 = ssub.f32 1.0, %s766_s0 }
  0x48   :  { %607 = dma.done.wait [#allocation10], 2048  }
  0x49   :  { %608 = vsyncadd [#allocation10], 4294965248  ;;  %v617_v0 = vmov 0.0|0.0   ;;  %vm618_vm0 = vmmov 0   ;;  %v619_v1 = vmov 0.0   ;;  %v718_v2 = vstv %s83_s10  ;;  %v104_v3 = vld [vmem:[#allocation8] sm:$0xff] }
  0x4a   :  { %429 = vmatprep.subr.bf16.mxu0 %v617_v0  ;;  %391 = vmatprep.mubr.msk.f32.mxu0 %vm618_vm0, %v619_v1  ;;  %489 = vrsqrt.f32 %v718_v2  ;;  %v105_v4 = vld [vmem:[#allocation8 + $0x8] sm:$0xff]  ;;  %v106_v5 = vld [vmem:[#allocation8 + $0x10] sm:$0xff]  ;;  %v107_v7 = vld [vmem:[#allocation8 + $0x18] sm:$0xff]  ;;  %vm95_vm1 = vcmp.eq.f32.partialorder %v718_v2, inf  ;;  %v98_v12 = vand.u32 2147483648, %v718_v2  ;;  %vm97_vm2 = vcmp.eq.f32.partialorder %v718_v2, 0.0 }
  0x4b   :  { %453 = vmatprep.subr.bf16.mxu1 %v617_v0  ;;  %426 = vmatprep.mubr.msk.f32.mxu1 %vm618_vm0, %v619_v1  ;;  %v430_v6 = vpack.c.bf16 %v105_v4, %v104_v3  ;;  %v433_v8 = vpack.c.bf16 %v107_v7, %v106_v5  ;;  %v108_v9 = vld [vmem:[#allocation8 + $0x20] sm:$0xff]  ;;  %v109_v10 = vld [vmem:[#allocation8 + $0x28] sm:$0xff]  ;;  %v210_v15 = vld [vmem:[#allocation9 + $0x10] sm:$0xff]  ;;  %v124_v61 = vlaneseq  ;;  %v121_v1 = vstv %s766_s0  ;;  %s620_s0 = smov [#allocation11]  }
  0x4c   :  { %v208_v13 = vld [vmem:[#allocation9] sm:$0xff]  ;;  %v209_v14 = vld [vmem:[#allocation9 + $0x8] sm:$0xff]  ;;  %v436_v17 = vpack.c.bf16 %v109_v10, %v108_v9  ;;  %v211_v19 = vld [vmem:[#allocation9 + $0x18] sm:$0xff] }
  0x4d   :  { %431 = vmatpush3.bf16.msra.mxu0 %v430_v6  ;;  %v454_v18 = vpack.c.bf16 %v209_v14, %v208_v13  ;;  %v110_v20 = vld [vmem:[#allocation8 + $0x30] sm:$0xff]  ;;  %v111_v21 = vld [vmem:[#allocation8 + $0x38] sm:$0xff]  ;;  %v457_v23 = vpack.c.bf16 %v211_v19, %v210_v15  ;;  %v212_v25 = vld [vmem:[#allocation9 + $0x20] sm:$0xff]  ;;  %v125_v62 = vshrl.u32 %v124_v61, 7 }
  0x4e   :  { %432 = vmatprep.subr.bf16.mxu0 %v617_v0  ;;  %v213_v26 = vld [vmem:[#allocation9 + $0x28] sm:$0xff]  ;;  %v439_v27 = vpack.c.bf16 %v111_v21, %v110_v20  ;;  %v112_v28 = vld [vmem:[#allocation8 + $0x40] sm:$0xff]  ;;  %v214_v31 = vld [vmem:[#allocation9 + $0x30] sm:$0xff] }
  0x4f   :  { %455 = vmatpush3.bf16.msra.mxu1 %v454_v18  ;;  %v113_v29 = vld [vmem:[#allocation8 + $0x48] sm:$0xff]  ;;  %v460_v30 = vpack.c.bf16 %v213_v26, %v212_v25  ;;  %v215_v32 = vld [vmem:[#allocation9 + $0x38] sm:$0xff]  ;;  %v114_v34 = vld [vmem:[#allocation8 + $0x50] sm:$0xff]  ;;  %v126_v4 = vsub.s32 0, %v125_v62 }
  0x50   :  { %456 = vmatprep.subr.bf16.mxu1 %v617_v0  ;;  %v442_v33 = vpack.c.bf16 %v113_v29, %v112_v28  ;;  %v115_v35 = vld [vmem:[#allocation8 + $0x58] sm:$0xff]  ;;  %v463_v36 = vpack.c.bf16 %v215_v32, %v214_v31  ;;  %v216_v37 = vld [vmem:[#allocation9 + $0x40] sm:$0xff]  ;;  %v217_v38 = vld [vmem:[#allocation9 + $0x48] sm:$0xff] }
  0x51   :  { %434 = vmatpush3.bf16.msra.mxu0 %v433_v8  ;;  %v445_v39 = vpack.c.bf16 %v115_v35, %v114_v34  ;;  %v116_v40 = vld [vmem:[#allocation8 + $0x60] sm:$0xff]  ;;  %v117_v41 = vld [vmem:[#allocation8 + $0x68] sm:$0xff]  ;;  %v466_v42 = vpack.c.bf16 %v217_v38, %v216_v37  ;;  %v218_v43 = vld [vmem:[#allocation9 + $0x50] sm:$0xff] }
  0x52   :  { %435 = vmatprep.subr.bf16.mxu0 %v617_v0  ;;  %v219_v44 = vld [vmem:[#allocation9 + $0x58] sm:$0xff]  ;;  %v448_v45 = vpack.c.bf16 %v117_v41, %v116_v40  ;;  %v118_v46 = vld [vmem:[#allocation8 + $0x70] sm:$0xff]  ;;  %v220_v55 = vld [vmem:[#allocation9 + $0x60] sm:$0xff] }
  0x53   :  { %458 = vmatpush3.bf16.msra.mxu1 %v457_v23  ;;  %v119_v47 = vld [vmem:[#allocation8 + $0x78] sm:$0xff]  ;;  %v469_v48 = vpack.c.bf16 %v219_v44, %v218_v43  ;;  %v88_v51 = vld [vmem:[#allocation3] sm:$0xff]  ;;  %v221_v56 = vld [vmem:[#allocation9 + $0x68] sm:$0xff] }
  0x54   :  { %v490_v11 = vpop.eup %489  ;;  %459 = vmatprep.subr.bf16.mxu1 %v617_v0  ;;  %v451_v49 = vpack.c.bf16 %v119_v47, %v118_v46  ;;  %v91_v50 = vld [vmem:[#allocation6] sm:$0xff]  ;;  %v472_v57 = vpack.c.bf16 %v221_v56, %v220_v55  ;;  %v222_v58 = vld [vmem:[#allocation9 + $0x70] sm:$0xff] }
  0x55   :  { %v94_v16 = vmul.f32 %v490_v11, %v718_v2  ;;  %437 = vmatpush3.bf16.msra.mxu0 %v436_v17  ;;  %v223_v59 = vld [vmem:[#allocation9 + $0x78] sm:$0xff]  ;;  %v120_v63 = vld [vmem:[%s770_s4] sm:$0x1]  ;;  %s312_s4 = sshll.u32 %s620_s0, 4  ;;  %s313_s4 = int_to_ptr.vmem [resolvable:$true] %s312_s4 }
  0x56   :  { %438 = vmatprep.subr.bf16.mxu0 %v617_v0  ;;  %v475_v60 = vpack.c.bf16 %v223_v59, %v222_v58  ;;  %v122_v3 = vmul.f32 %v121_v1, %v120_v63  ;;  %v324_v11 = vld [vmem:[%s773_s7] ss:$0 sm:$0xff]  ;;  %p586_p5 = scmp.lt.s32.totalorder %s313_s4, %s313_s4 }
  0x57   :  { %v96_v22 = vsel %vm95_vm1, %v718_v2, %v94_v16  ;;  %461 = vmatpush3.bf16.msra.mxu1 %v460_v30 }
  0x58   :  { %v99_v24 = vsel %vm97_vm2, %v98_v12, %v96_v22  ;;  %462 = vmatprep.subr.bf16.mxu1 %v617_v0  ;;  %v127_v5 = vrot.slane %v122_v3, %v126_v4 }
  0x59   :  { %477 = vpush %v99_v24  ;;  %440 = vmatpush3.bf16.msra.mxu0 %v439_v27 }
  0x5a   :  { %441 = vmatprep.subr.bf16.mxu0 %v617_v0 }
  0x5b   :  { %464 = vmatpush3.bf16.msra.mxu1 %v463_v36 }
  0x5c   :  { %465 = vmatprep.subr.bf16.mxu1 %v617_v0 }
  0x5d   :  { %443 = vmatpush3.bf16.msra.mxu0 %v442_v33 }
  0x5e   :  { %444 = vmatprep.subr.bf16.mxu0 %v617_v0 }
  0x5f   :  { %467 = vmatpush3.bf16.msra.mxu1 %v466_v42 }
  0x60   :  { %468 = vmatprep.subr.bf16.mxu1 %v617_v0 }
  0x61   :  { %446 = vmatpush3.bf16.msra.mxu0 %v445_v39 }
  0x62   :  { %447 = vmatprep.subr.bf16.mxu0 %v617_v0 }
  0x63   :  { %470 = vmatpush3.bf16.msra.mxu1 %v469_v48 }
  0x64   :  { %471 = vmatprep.subr.bf16.mxu1 %v617_v0 }
  0x65   :  { %449 = vmatpush3.bf16.msra.mxu0 %v448_v45 }
  0x66   :  { %450 = vmatprep.subr.bf16.mxu0 %v617_v0 }
  0x67   :  { %473 = vmatpush3.bf16.msra.mxu1 %v472_v57 }
  0x68   :  { %474 = vmatprep.subr.bf16.mxu1 %v617_v0  ;;  %v323_v0 = vld [vmem:[%s771_s5] ss:$0 sm:$0xff]  ;;  %s581_s5 = scalar_lea.vmem %s313_s4, 128 }
  0x69   :  { %452 = vmatpush3.bf16.msra.mxu0 %v451_v49  ;;  %p582_p4 = scmp.ne.s32.totalorder %s313_s4, %s581_s5  ;;  %p587_p6 = scmp.lt.s32.totalorder %s581_s5, %s581_s5 }
  0x6b   :  { %476 = vmatpush3.bf16.msra.mxu1 %v475_v60  ;;  %p588_p7 = por %p587_p6, %p586_p5 }
  0x6d   :  { %p589_p8 = pnand %p588_p7, %p582_p4 }
  0x8a   :  { %s478_s6 = spop %477 }
  0x8b   :  { %v101_v52 = vstv %s478_s6 }
  0x8c   :  { %v102_v53 = vmul.f32 %v101_v52, %v91_v50 }
  0x8e   :  { %v103_v54 = vadd.f32 %v102_v53, %v88_v51 }
  0x90   :  { %392 = vmatmul.mubr.f32.vlgmr.msra.gmra.mrb[0].mxu0 %v103_v54 }
 0x163   :  { %v195_v6 = vpop.f32.mrb[0].mxu0 }
 0x164   :  { %v196_v7 = vadd.f32 %v195_v6, %v127_v5  ;;  %v393_v8 = vpop.f32.mrb[1].mxu0 }
 0x166   :  { %v206_v9 = vadd.f32 %v323_v0, %v196_v7 }
 0x168   :  { %v207_v10 = vmax.f32 %v206_v9, 0.0 }
 0x16a   :  { %427 = vmatmul.mubr.f32.vlgmr.msra.gmra.mrb[0].mxu1 %v207_v10 }
 0x23d   :  { %v297_v12 = vpop.f32.mrb[0].mxu1 }
 0x23e   :  { %v298_v13 = vadd.f32 %v324_v11, %v297_v12  ;;  %v428_v14 = vpop.f32.mrb[1].mxu1 }
 0x240   :  { %491 = vtanh.f32 %v298_v13 }
 0x24a   :  { %v492_v15 = vpop.eup %491 }
 0x24b   :  { %v303_v16 = vmul.f32 %v492_v15, %v718_v2 }
 0x24d   :  { %v304_v17 = vadd.f32 %v303_v16, %v103_v54 }
 0x24f   :  { %305 = vst [vmem:[#allocation11] sm:$0xff] %v304_v17 }
 0x250   :  { %592 = shalt.err (!%p589_p8)
}
 0x251   :  { %s593_s18 = scalar_lea.hbm %s774_s8, 128 }
 0x252   :  { %p594_p9 = scmp.ne.s32.totalorder %s774_s8, %s593_s18  ;;  %p597_p10 = scmp.lt.u32.totalorder %s593_s18, %s774_s8 }
 0x254   :  { %p599_p11 = pnand %p597_p10, %p594_p9 }
 0x256   :  { %602 = shalt.err (!%p599_p11)
}
 0x257   :  { %315 = dma.vmem_to_hbm [thread:$0]  %s313_s4, 128, %s774_s8, [#allocation5]  }
 0x258   :  { %609 = dma.done.wait [#allocation5], 128  }
 0x259   :  { %610 = vsyncadd [#allocation5], 4294967168 }
 0x25a   :  { %319 = vsyncpa [#allocation4], 1 }
 0x25b   :  { %320 = vsyncpa [#allocation7], 1 }
 0x25c   :  { %321 = vsyncpa [#allocation10], 1 }
 0x25d   :  { %322 = vsyncpa [#allocation5], 1 }

</bundles_post_ra>
